<compile_context>
chip_gen: v6e
topology: v6e:2x2x1
jax: 0.10.0
libtpu: 0.0.40
codegen_flags: <defaults>
</compile_context>

<pallas_src>
import math

import jax
import jax.numpy as jnp
from jax.experimental import pallas as pl
from jax.experimental.pallas import tpu as pltpu


def _vmem_capacity_bytes():
    """Per-core VMEM capacity (64 MiB on v7x, 128 MiB on v5e/v6e)."""
    try:
        return int(pltpu.get_tpu_info().vmem_capacity_bytes)
    except Exception:
        return 64 << 20  # conservative default (v7x)


def _make_conv_bn_silu_upsample_kernel(th, W):
    """Fused 1x1 conv + folded-BN bias + SiLU + nearest-2x upsample.

    Refs per grid step:
      x_ref: (Cin, th*W)     input row-tile (channels on sublanes, flat spatial on lanes)
      w_ref: (Cout, Cin)     conv weight with the BN scale folded in
      d_ref: (W, 4W)         constant 0/1 duplication matrix
      b_ref: (Cout, 1)       folded BN bias (f32)
      o_ref: (Cout, 4*th*W)  upsampled output row-tile (flat row-major over (2H, 2W))
      y_ref: (Cout, th*W)    VMEM scratch holding the SiLU'd conv output
    """

    def kernel(x_ref, w_ref, d_ref, b_ref, o_ref, y_ref):
        # 1x1 conv == channel matmul over the whole lane-dense row tile (MXU).
        y = jnp.dot(w_ref[...], x_ref[...], preferred_element_type=jnp.float32)
        y = y + b_ref[...]                                   # BN bias, broadcast over lanes
        y_ref[...] = (y * jax.nn.sigmoid(y)).astype(y_ref.dtype)   # SiLU

        d = d_ref[...]
        # Fused nearest-neighbour 2x upsample: per input row, one matmul with the
        # constant duplication matrix emits both duplicated output rows, already
        # column-interleaved and flattened -> one contiguous lane-slice store.
        for r in range(th):                                   # static unroll (th <= ~64)
            yr = y_ref[:, r * W:(r + 1) * W]                               # (Cout, W)
            up = jnp.dot(yr, d, preferred_element_type=jnp.float32)        # (Cout, 4W)
            o_ref[:, r * 4 * W:(r + 1) * 4 * W] = up.astype(o_ref.dtype)

    return kernel


def _pick_row_tile(N, H, W, Cin, Cout, itemsize, budget_bytes,
                   max_rows=64, max_lanes=8192):
    """Rows per spatial tile.  th*W must be a 128-multiple unless th == H
    (block shape == full array dims is always legal).  Returns (th, bytes/step)."""
    step = 128 // math.gcd(W, 128)

    ci = ((Cin + 7) // 8) * 8
    co = ((Cout + 7) // 8) * 8

    def tile_bytes(th):
        lanes = th * W
        return (2 * ci * lanes * itemsize          # input tile, double-buffered
                + 2 * co * 4 * lanes * itemsize    # fused upsampled output, double-buffered
                + co * lanes * itemsize            # SiLU scratch
                + co * lanes * 4)                  # f32 matmul intermediate

    if step > H:
        return H, tile_bytes(H)                    # full-height block

    cap = min(H, max_rows, max(max_lanes // W, 1))
    if N == 1 and H >= 2 * step:
        cap = min(cap, (H + 1) // 2)               # >=2 spatial tiles when batch == 1
    th = max(step, (cap // step) * step)
    while th > step and tile_bytes(th) > budget_bytes:
        th -= step
    return th, tile_bytes(th)


def upsample_block_forward(x_nchw, conv_w, bn_gamma, bn_beta, bn_mean, bn_var,
                           eps=1e-5):
    """UpsampleBlock.forward: ConvBlock(1x1 conv + BN + SiLU) -> nearest 2x up."""
    N, Cin, H, W = x_nchw.shape
    Cout = conv_w.shape[0]
    S = H * W
    dtype = x_nchw.dtype
    itemsize = jnp.dtype(dtype).itemsize

    # Fold eval-mode BatchNorm into the conv weight and a per-channel f32 bias.
    scale = (bn_gamma / jnp.sqrt(bn_var + eps)).astype(jnp.float32)
    bias = (bn_beta.astype(jnp.float32) -
            bn_mean.astype(jnp.float32) * scale).reshape(Cout, 1)
    w_mat = (conv_w.reshape(Cout, Cin).astype(jnp.float32) *
             scale[:, None]).astype(dtype)

    # Constant 0/1 duplication matrix: row (W,) -> flattened duplicated row pair (4W,)
    #   out[a*2W + 2j + p] = in[j]   for a, p in {0, 1}.
    j = jnp.arange(W, dtype=jnp.int32)[:, None]
    m = jnp.arange(4 * W, dtype=jnp.int32)[None, :]
    dup = ((m % (2 * W)) // 2 == j).astype(dtype)

    cap = _vmem_capacity_bytes()
    th, tile_bytes = _pick_row_tile(N, H, W, Cin, Cout, itemsize,
                                    budget_bytes=cap // 4)

    const_bytes = 2 * ((Cout * Cin + W * 4 * W) * itemsize + Cout * 4)
    vmem_limit = int(min(max(2 * (tile_bytes + const_bytes), 32 << 20),
                         (cap * 3) // 4))          # ~48 MiB on v7x, ~96 MiB on v5e/v6e

    grid = (N, pl.cdiv(H, th))                     # ragged last row-tile is fine
    x_flat = x_nchw.reshape(N, Cin, S)             # NCHW kept end to end, free reshape

    out_flat = pl.pallas_call(
        _make_conv_bn_silu_upsample_kernel(th, W),
        out_shape=jax.ShapeDtypeStruct((N, Cout, 4 * S), dtype),
        grid_spec=pltpu.PrefetchScalarGridSpec(
            num_scalar_prefetch=0,
            grid=grid,
            in_specs=[
                pl.BlockSpec((None, Cin, th * W), lambda n, s: (n, 0, s)),   # x row-tile
                pl.BlockSpec((Cout, Cin), lambda n, s: (0, 0)),              # folded weight
                pl.BlockSpec((W, 4 * W), lambda n, s: (0, 0)),               # dup matrix
                pl.BlockSpec((Cout, 1), lambda n, s: (0, 0)),                # folded bias
            ],
            out_specs=pl.BlockSpec((None, Cout, 4 * th * W), lambda n, s: (n, 0, s)),
            scratch_shapes=[pltpu.VMEM((Cout, th * W), dtype)],
        ),
        compiler_params=pltpu.CompilerParams(
            dimension_semantics=("parallel", "parallel"),
            vmem_limit_bytes=vmem_limit,
        ),
    )(x_flat, w_mat, dup, bias)

    # Free reshape: flat offset (2i+a)*2W + k is exactly row-major over (2H, 2W).
    return out_flat.reshape(N, Cout, 2 * H, 2 * W)


def _reference_forward(x, conv_w, gamma, beta, mean, var, eps=1e-5):
    """Pure-JAX reference matching PyTorch eval-mode forward (NCHW)."""
    y = jax.lax.conv_general_dilated(
        x, conv_w, window_strides=(1, 1), padding="VALID",
        dimension_numbers=("NCHW", "OIHW", "NCHW"))
    y = (y - mean[None, :, None, None]) / jnp.sqrt(var[None, :, None, None] + eps)
    y = y * gamma[None, :, None, None] + beta[None, :, None, None]
    y = y * jax.nn.sigmoid(y)
    return jnp.repeat(jnp.repeat(y, 2, axis=2), 2, axis=3)


if __name__ == "__main__":
    keys = jax.random.split(jax.random.PRNGKey(0), 12)
    fwd = jax.jit(upsample_block_forward)

    # --- Test 1: module-default f32, small square map -----------------------
    N1, Ci1, Co1, H1, W1 = 2, 4, 8, 16, 16
    x1 = jax.random.normal(keys[0], (N1, Ci1, H1, W1), dtype=jnp.float32)
    w1 = jax.random.normal(keys[1], (Co1, Ci1, 1, 1), dtype=jnp.float32) * 0.1
    g1 = 1.0 + 0.1 * jax.random.normal(keys[2], (Co1,), dtype=jnp.float32)
    b1 = 0.1 * jax.random.normal(keys[3], (Co1,), dtype=jnp.float32)
    m1 = 0.1 * jax.random.normal(keys[4], (Co1,), dtype=jnp.float32)
    v1 = 1.0 + 0.1 * jax.random.uniform(keys[5], (Co1,), dtype=jnp.float32)

    out1 = jax.block_until_ready(fwd(x1, w1, g1, b1, m1, v1))
    ref1 = jax.block_until_ready(_reference_forward(x1, w1, g1, b1, m1, v1))
    assert out1.shape == (N1, Co1, 2 * H1, 2 * W1), out1.shape
    assert jnp.allclose(out1, ref1, atol=1e-4, rtol=1e-4), "f32 mismatch vs reference"

    # --- Test 2: bf16 activations, batch=1, ragged multi-block row tiling ---
    N2, Ci2, Co2, H2, W2 = 1, 8, 16, 72, 16
    x2 = jax.random.normal(keys[6], (N2, Ci2, H2, W2), dtype=jnp.float32)
    w2 = jax.random.normal(keys[7], (Co2, Ci2, 1, 1), dtype=jnp.float32) * 0.1
    g2 = 1.0 + 0.1 * jax.random.normal(keys[8], (Co2,), dtype=jnp.float32)
    b2 = 0.1 * jax.random.normal(keys[9], (Co2,), dtype=jnp.float32)
    m2 = 0.1 * jax.random.normal(keys[10], (Co2,), dtype=jnp.float32)
    v2 = 1.0 + 0.1 * jax.random.uniform(keys[11], (Co2,), dtype=jnp.float32)

    out2 = jax.block_until_ready(fwd(x2.astype(jnp.bfloat16), w2, g2, b2, m2, v2))
    ref2 = jax.block_until_ready(_reference_forward(x2, w2, g2, b2, m2, v2))
    assert out2.dtype == jnp.bfloat16
    assert out2.shape == (N2, Co2, 2 * H2, 2 * W2), out2.shape
    assert jnp.allclose(out2.astype(jnp.float32), ref2, atol=2e-2, rtol=2e-2), \
        "bf16 mismatch vs reference"

    print("KERNEL_OK")
</pallas_src>

<mosaic_0001>
module attributes {stable_mosaic.version = 11 : i64} {
  func.func @kernel(%arg0: i32, %arg1: i32, %arg2: memref<1x4x256xf32, #tpu.memory_space<vmem>>, %arg3: memref<8x4xf32, #tpu.memory_space<vmem>>, %arg4: memref<16x64xf32, #tpu.memory_space<vmem>>, %arg5: memref<8x1xf32, #tpu.memory_space<vmem>>, %arg6: memref<1x8x1024xf32, #tpu.memory_space<vmem>>, %arg7: memref<8x256xf32, #tpu.memory_space<vmem>>) attributes {dimension_semantics = [#tpu.dimension_semantics<parallel>, #tpu.dimension_semantics<parallel>], iteration_bounds = array<i64: 2, 1>, scalar_prefetch = 0 : i64, scratch_operands = 1 : i64, tpu.core_type = #tpu.core_type<tc>, window_params = [{transform_indices = @transform_0, window_bounds = array<i64: 1, 4, 256>}, {pipeline_mode = #tpu.pipeline_mode<synchronous>, transform_indices = @transform_1, window_bounds = array<i64: 8, 4>}, {pipeline_mode = #tpu.pipeline_mode<synchronous>, transform_indices = @transform_2, window_bounds = array<i64: 16, 64>}, {pipeline_mode = #tpu.pipeline_mode<synchronous>, transform_indices = @transform_3, window_bounds = array<i64: 8, 1>}, {transform_indices = @transform_4, window_bounds = array<i64: 1, 8, 1024>}]} {
    %c0 = arith.constant 0 : index
    %c0_0 = arith.constant 0 : index
    %0 = vector.load %arg3[%c0, %c0_0] : memref<8x4xf32, #tpu.memory_space<vmem>>, vector<8x4xf32>
    %c0_1 = arith.constant 0 : index
    %c0_2 = arith.constant 0 : index
    %c0_3 = arith.constant 0 : index
    %1 = vector.load %arg2[%c0_1, %c0_2, %c0_3] : memref<1x4x256xf32, #tpu.memory_space<vmem>>, vector<1x4x256xf32>
    %2 = vector.shape_cast %1 : vector<1x4x256xf32> to vector<4x256xf32>
    %cst = arith.constant dense<0.000000e+00> : vector<8x256xf32>
    %3 = tpu.matmul %0, %2, %cst {dimension_numbers = #tpu.dot_dimension_numbers<[1], [0], [0], [1], [0, 0, 1, 1], [], []>} : vector<8x4xf32>, vector<4x256xf32>, vector<8x256xf32> -> vector<8x256xf32>
    %c0_4 = arith.constant 0 : index
    %c0_5 = arith.constant 0 : index
    %4 = vector.load %arg5[%c0_4, %c0_5] : memref<8x1xf32, #tpu.memory_space<vmem>>, vector<8x1xf32>
    %5 = vector.broadcast %4 : vector<8x1xf32> to vector<8x256xf32>
    %6 = arith.addf %3, %5 : vector<8x256xf32>
    %7 = arith.negf %6 : vector<8x256xf32>
    %8 = math.exp %7 : vector<8x256xf32>
    %cst_6 = arith.constant 1.000000e+00 : f32
    %9 = vector.broadcast %cst_6 : f32 to vector<8x256xf32>
    %10 = arith.addf %9, %8 : vector<8x256xf32>
    %11 = arith.divf %9, %10 : vector<8x256xf32>
    %12 = arith.mulf %6, %11 : vector<8x256xf32>
    %c0_7 = arith.constant 0 : index
    %c0_8 = arith.constant 0 : index
    %13 = vector.load %arg7[%c0_7, %c0_8] : memref<8x256xf32, #tpu.memory_space<vmem>>, vector<8x256xf32>
    tpu.vector_store %arg7[%c0_7, %c0_8], %12 {strides = array<i32>} : memref<8x256xf32, #tpu.memory_space<vmem>>, vector<8x256xf32>,
    %c0_9 = arith.constant 0 : index
    %c0_10 = arith.constant 0 : index
    %14 = vector.load %arg4[%c0_9, %c0_10] : memref<16x64xf32, #tpu.memory_space<vmem>>, vector<16x64xf32>
    %c0_11 = arith.constant 0 : index
    %c0_12 = arith.constant 0 : index
    %15 = vector.load %arg7[%c0_11, %c0_12] : memref<8x256xf32, #tpu.memory_space<vmem>>, vector<8x16xf32>
    %cst_13 = arith.constant dense<0.000000e+00> : vector<8x64xf32>
    %16 = tpu.matmul %15, %14, %cst_13 {dimension_numbers = #tpu.dot_dimension_numbers<[1], [0], [0], [1], [0, 0, 1, 1], [], []>} : vector<8x16xf32>, vector<16x64xf32>, vector<8x64xf32> -> vector<8x64xf32>
    %c0_14 = arith.constant 0 : index
    %c0_15 = arith.constant 0 : index
    %c0_16 = arith.constant 0 : index
    %17 = vector.load %arg6[%c0_14, %c0_15, %c0_16] : memref<1x8x1024xf32, #tpu.memory_space<vmem>>, vector<1x8x64xf32>
    %18 = vector.shape_cast %17 : vector<1x8x64xf32> to vector<8x64xf32>
    %19 = vector.shape_cast %16 : vector<8x64xf32> to vector<1x8x64xf32>
    tpu.vector_store %arg6[%c0_14, %c0_15, %c0_16], %19 {strides = array<i32>} : memref<1x8x1024xf32, #tpu.memory_space<vmem>>, vector<1x8x64xf32>,
    %c0_17 = arith.constant 0 : index
    %c16 = arith.constant 16 : index
    %20 = vector.load %arg7[%c0_17, %c16] : memref<8x256xf32, #tpu.memory_space<vmem>>, vector<8x16xf32>
    %cst_18 = arith.constant dense<0.000000e+00> : vector<8x64xf32>
    %21 = tpu.matmul %20, %14, %cst_18 {dimension_numbers = #tpu.dot_dimension_numbers<[1], [0], [0], [1], [0, 0, 1, 1], [], []>} : vector<8x16xf32>, vector<16x64xf32>, vector<8x64xf32> -> vector<8x64xf32>
    %c0_19 = arith.constant 0 : index
    %c0_20 = arith.constant 0 : index
    %c64 = arith.constant 64 : index
    %22 = vector.load %arg6[%c0_19, %c0_20, %c64] : memref<1x8x1024xf32, #tpu.memory_space<vmem>>, vector<1x8x64xf32>
    %23 = vector.shape_cast %22 : vector<1x8x64xf32> to vector<8x64xf32>
    %24 = vector.shape_cast %21 : vector<8x64xf32> to vector<1x8x64xf32>
    tpu.vector_store %arg6[%c0_19, %c0_20, %c64], %24 {strides = array<i32>} : memref<1x8x1024xf32, #tpu.memory_space<vmem>>, vector<1x8x64xf32>,
    %c0_21 = arith.constant 0 : index
    %c32 = arith.constant 32 : index
    %25 = vector.load %arg7[%c0_21, %c32] : memref<8x256xf32, #tpu.memory_space<vmem>>, vector<8x16xf32>
    %cst_22 = arith.constant dense<0.000000e+00> : vector<8x64xf32>
    %26 = tpu.matmul %25, %14, %cst_22 {dimension_numbers = #tpu.dot_dimension_numbers<[1], [0], [0], [1], [0, 0, 1, 1], [], []>} : vector<8x16xf32>, vector<16x64xf32>, vector<8x64xf32> -> vector<8x64xf32>
    %c0_23 = arith.constant 0 : index
    %c0_24 = arith.constant 0 : index
    %c128 = arith.constant 128 : index
    %27 = vector.load %arg6[%c0_23, %c0_24, %c128] : memref<1x8x1024xf32, #tpu.memory_space<vmem>>, vector<1x8x64xf32>
    %28 = vector.shape_cast %27 : vector<1x8x64xf32> to vector<8x64xf32>
    %29 = vector.shape_cast %26 : vector<8x64xf32> to vector<1x8x64xf32>
    tpu.vector_store %arg6[%c0_23, %c0_24, %c128], %29 {strides = array<i32>} : memref<1x8x1024xf32, #tpu.memory_space<vmem>>, vector<1x8x64xf32>,
    %c0_25 = arith.constant 0 : index
    %c48 = arith.constant 48 : index
    %30 = vector.load %arg7[%c0_25, %c48] : memref<8x256xf32, #tpu.memory_space<vmem>>, vector<8x16xf32>
    %cst_26 = arith.constant dense<0.000000e+00> : vector<8x64xf32>
    %31 = tpu.matmul %30, %14, %cst_26 {dimension_numbers = #tpu.dot_dimension_numbers<[1], [0], [0], [1], [0, 0, 1, 1], [], []>} : vector<8x16xf32>, vector<16x64xf32>, vector<8x64xf32> -> vector<8x64xf32>
    %c0_27 = arith.constant 0 : index
    %c0_28 = arith.constant 0 : index
    %c192 = arith.constant 192 : index
    %32 = vector.load %arg6[%c0_27, %c0_28, %c192] : memref<1x8x1024xf32, #tpu.memory_space<vmem>>, vector<1x8x64xf32>
    %33 = vector.shape_cast %32 : vector<1x8x64xf32> to vector<8x64xf32>
    %34 = vector.shape_cast %31 : vector<8x64xf32> to vector<1x8x64xf32>
    tpu.vector_store %arg6[%c0_27, %c0_28, %c192], %34 {strides = array<i32>} : memref<1x8x1024xf32, #tpu.memory_space<vmem>>, vector<1x8x64xf32>,
    %c0_29 = arith.constant 0 : index
    %c64_30 = arith.constant 64 : index
    %35 = vector.load %arg7[%c0_29, %c64_30] : memref<8x256xf32, #tpu.memory_space<vmem>>, vector<8x16xf32>
    %cst_31 = arith.constant dense<0.000000e+00> : vector<8x64xf32>
    %36 = tpu.matmul %35, %14, %cst_31 {dimension_numbers = #tpu.dot_dimension_numbers<[1], [0], [0], [1], [0, 0, 1, 1], [], []>} : vector<8x16xf32>, vector<16x64xf32>, vector<8x64xf32> -> vector<8x64xf32>
    %c0_32 = arith.constant 0 : index
    %c0_33 = arith.constant 0 : index
    %c256 = arith.constant 256 : index
    %37 = vector.load %arg6[%c0_32, %c0_33, %c256] : memref<1x8x1024xf32, #tpu.memory_space<vmem>>, vector<1x8x64xf32>
    %38 = vector.shape_cast %37 : vector<1x8x64xf32> to vector<8x64xf32>
    %39 = vector.shape_cast %36 : vector<8x64xf32> to vector<1x8x64xf32>
    tpu.vector_store %arg6[%c0_32, %c0_33, %c256], %39 {strides = array<i32>} : memref<1x8x1024xf32, #tpu.memory_space<vmem>>, vector<1x8x64xf32>,
    %c0_34 = arith.constant 0 : index
    %c80 = arith.constant 80 : index
    %40 = vector.load %arg7[%c0_34, %c80] : memref<8x256xf32, #tpu.memory_space<vmem>>, vector<8x16xf32>
    %cst_35 = arith.constant dense<0.000000e+00> : vector<8x64xf32>
    %41 = tpu.matmul %40, %14, %cst_35 {dimension_numbers = #tpu.dot_dimension_numbers<[1], [0], [0], [1], [0, 0, 1, 1], [], []>} : vector<8x16xf32>, vector<16x64xf32>, vector<8x64xf32> -> vector<8x64xf32>
    %c0_36 = arith.constant 0 : index
    %c0_37 = arith.constant 0 : index
    %c320 = arith.constant 320 : index
    %42 = vector.load %arg6[%c0_36, %c0_37, %c320] : memref<1x8x1024xf32, #tpu.memory_space<vmem>>, vector<1x8x64xf32>
    %43 = vector.shape_cast %42 : vector<1x8x64xf32> to vector<8x64xf32>
    %44 = vector.shape_cast %41 : vector<8x64xf32> to vector<1x8x64xf32>
    tpu.vector_store %arg6[%c0_36, %c0_37, %c320], %44 {strides = array<i32>} : memref<1x8x1024xf32, #tpu.memory_space<vmem>>, vector<1x8x64xf32>,
    %c0_38 = arith.constant 0 : index
    %c96 = arith.constant 96 : index
    %45 = vector.load %arg7[%c0_38, %c96] : memref<8x256xf32, #tpu.memory_space<vmem>>, vector<8x16xf32>
    %cst_39 = arith.constant dense<0.000000e+00> : vector<8x64xf32>
    %46 = tpu.matmul %45, %14, %cst_39 {dimension_numbers = #tpu.dot_dimension_numbers<[1], [0], [0], [1], [0, 0, 1, 1], [], []>} : vector<8x16xf32>, vector<16x64xf32>, vector<8x64xf32> -> vector<8x64xf32>
    %c0_40 = arith.constant 0 : index
    %c0_41 = arith.constant 0 : index
    %c384 = arith.constant 384 : index
    %47 = vector.load %arg6[%c0_40, %c0_41, %c384] : memref<1x8x1024xf32, #tpu.memory_space<vmem>>, vector<1x8x64xf32>
    %48 = vector.shape_cast %47 : vector<1x8x64xf32> to vector<8x64xf32>
    %49 = vector.shape_cast %46 : vector<8x64xf32> to vector<1x8x64xf32>
    tpu.vector_store %arg6[%c0_40, %c0_41, %c384], %49 {strides = array<i32>} : memref<1x8x1024xf32, #tpu.memory_space<vmem>>, vector<1x8x64xf32>,
    %c0_42 = arith.constant 0 : index
    %c112 = arith.constant 112 : index
    %50 = vector.load %arg7[%c0_42, %c112] : memref<8x256xf32, #tpu.memory_space<vmem>>, vector<8x16xf32>
    %cst_43 = arith.constant dense<0.000000e+00> : vector<8x64xf32>
    %51 = tpu.matmul %50, %14, %cst_43 {dimension_numbers = #tpu.dot_dimension_numbers<[1], [0], [0], [1], [0, 0, 1, 1], [], []>} : vector<8x16xf32>, vector<16x64xf32>, vector<8x64xf32> -> vector<8x64xf32>
    %c0_44 = arith.constant 0 : index
    %c0_45 = arith.constant 0 : index
    %c448 = arith.constant 448 : index
    %52 = vector.load %arg6[%c0_44, %c0_45, %c448] : memref<1x8x1024xf32, #tpu.memory_space<vmem>>, vector<1x8x64xf32>
    %53 = vector.shape_cast %52 : vector<1x8x64xf32> to vector<8x64xf32>
    %54 = vector.shape_cast %51 : vector<8x64xf32> to vector<1x8x64xf32>
    tpu.vector_store %arg6[%c0_44, %c0_45, %c448], %54 {strides = array<i32>} : memref<1x8x1024xf32, #tpu.memory_space<vmem>>, vector<1x8x64xf32>,
    %c0_46 = arith.constant 0 : index
    %c128_47 = arith.constant 128 : index
    %55 = vector.load %arg7[%c0_46, %c128_47] : memref<8x256xf32, #tpu.memory_space<vmem>>, vector<8x16xf32>
    %cst_48 = arith.constant dense<0.000000e+00> : vector<8x64xf32>
    %56 = tpu.matmul %55, %14, %cst_48 {dimension_numbers = #tpu.dot_dimension_numbers<[1], [0], [0], [1], [0, 0, 1, 1], [], []>} : vector<8x16xf32>, vector<16x64xf32>, vector<8x64xf32> -> vector<8x64xf32>
    %c0_49 = arith.constant 0 : index
    %c0_50 = arith.constant 0 : index
    %c512 = arith.constant 512 : index
    %57 = vector.load %arg6[%c0_49, %c0_50, %c512] : memref<1x8x1024xf32, #tpu.memory_space<vmem>>, vector<1x8x64xf32>
    %58 = vector.shape_cast %57 : vector<1x8x64xf32> to vector<8x64xf32>
    %59 = vector.shape_cast %56 : vector<8x64xf32> to vector<1x8x64xf32>
    tpu.vector_store %arg6[%c0_49, %c0_50, %c512], %59 {strides = array<i32>} : memref<1x8x1024xf32, #tpu.memory_space<vmem>>, vector<1x8x64xf32>,
    %c0_51 = arith.constant 0 : index
    %c144 = arith.constant 144 : index
    %60 = vector.load %arg7[%c0_51, %c144] : memref<8x256xf32, #tpu.memory_space<vmem>>, vector<8x16xf32>
    %cst_52 = arith.constant dense<0.000000e+00> : vector<8x64xf32>
    %61 = tpu.matmul %60, %14, %cst_52 {dimension_numbers = #tpu.dot_dimension_numbers<[1], [0], [0], [1], [0, 0, 1, 1], [], []>} : vector<8x16xf32>, vector<16x64xf32>, vector<8x64xf32> -> vector<8x64xf32>
    %c0_53 = arith.constant 0 : index
    %c0_54 = arith.constant 0 : index
    %c576 = arith.constant 576 : index
    %62 = vector.load %arg6[%c0_53, %c0_54, %c576] : memref<1x8x1024xf32, #tpu.memory_space<vmem>>, vector<1x8x64xf32>
    %63 = vector.shape_cast %62 : vector<1x8x64xf32> to vector<8x64xf32>
    %64 = vector.shape_cast %61 : vector<8x64xf32> to vector<1x8x64xf32>
    tpu.vector_store %arg6[%c0_53, %c0_54, %c576], %64 {strides = array<i32>} : memref<1x8x1024xf32, #tpu.memory_space<vmem>>, vector<1x8x64xf32>,
    %c0_55 = arith.constant 0 : index
    %c160 = arith.constant 160 : index
    %65 = vector.load %arg7[%c0_55, %c160] : memref<8x256xf32, #tpu.memory_space<vmem>>, vector<8x16xf32>
    %cst_56 = arith.constant dense<0.000000e+00> : vector<8x64xf32>
    %66 = tpu.matmul %65, %14, %cst_56 {dimension_numbers = #tpu.dot_dimension_numbers<[1], [0], [0], [1], [0, 0, 1, 1], [], []>} : vector<8x16xf32>, vector<16x64xf32>, vector<8x64xf32> -> vector<8x64xf32>
    %c0_57 = arith.constant 0 : index
    %c0_58 = arith.constant 0 : index
    %c640 = arith.constant 640 : index
    %67 = vector.load %arg6[%c0_57, %c0_58, %c640] : memref<1x8x1024xf32, #tpu.memory_space<vmem>>, vector<1x8x64xf32>
    %68 = vector.shape_cast %67 : vector<1x8x64xf32> to vector<8x64xf32>
    %69 = vector.shape_cast %66 : vector<8x64xf32> to vector<1x8x64xf32>
    tpu.vector_store %arg6[%c0_57, %c0_58, %c640], %69 {strides = array<i32>} : memref<1x8x1024xf32, #tpu.memory_space<vmem>>, vector<1x8x64xf32>,
    %c0_59 = arith.constant 0 : index
    %c176 = arith.constant 176 : index
    %70 = vector.load %arg7[%c0_59, %c176] : memref<8x256xf32, #tpu.memory_space<vmem>>, vector<8x16xf32>
    %cst_60 = arith.constant dense<0.000000e+00> : vector<8x64xf32>
    %71 = tpu.matmul %70, %14, %cst_60 {dimension_numbers = #tpu.dot_dimension_numbers<[1], [0], [0], [1], [0, 0, 1, 1], [], []>} : vector<8x16xf32>, vector<16x64xf32>, vector<8x64xf32> -> vector<8x64xf32>
    %c0_61 = arith.constant 0 : index
    %c0_62 = arith.constant 0 : index
    %c704 = arith.constant 704 : index
    %72 = vector.load %arg6[%c0_61, %c0_62, %c704] : memref<1x8x1024xf32, #tpu.memory_space<vmem>>, vector<1x8x64xf32>
    %73 = vector.shape_cast %72 : vector<1x8x64xf32> to vector<8x64xf32>
    %74 = vector.shape_cast %71 : vector<8x64xf32> to vector<1x8x64xf32>
    tpu.vector_store %arg6[%c0_61, %c0_62, %c704], %74 {strides = array<i32>} : memref<1x8x1024xf32, #tpu.memory_space<vmem>>, vector<1x8x64xf32>,
    %c0_63 = arith.constant 0 : index
    %c192_64 = arith.constant 192 : index
    %75 = vector.load %arg7[%c0_63, %c192_64] : memref<8x256xf32, #tpu.memory_space<vmem>>, vector<8x16xf32>
    %cst_65 = arith.constant dense<0.000000e+00> : vector<8x64xf32>
    %76 = tpu.matmul %75, %14, %cst_65 {dimension_numbers = #tpu.dot_dimension_numbers<[1], [0], [0], [1], [0, 0, 1, 1], [], []>} : vector<8x16xf32>, vector<16x64xf32>, vector<8x64xf32> -> vector<8x64xf32>
    %c0_66 = arith.constant 0 : index
    %c0_67 = arith.constant 0 : index
    %c768 = arith.constant 768 : index
    %77 = vector.load %arg6[%c0_66, %c0_67, %c768] : memref<1x8x1024xf32, #tpu.memory_space<vmem>>, vector<1x8x64xf32>
    %78 = vector.shape_cast %77 : vector<1x8x64xf32> to vector<8x64xf32>
    %79 = vector.shape_cast %76 : vector<8x64xf32> to vector<1x8x64xf32>
    tpu.vector_store %arg6[%c0_66, %c0_67, %c768], %79 {strides = array<i32>} : memref<1x8x1024xf32, #tpu.memory_space<vmem>>, vector<1x8x64xf32>,
    %c0_68 = arith.constant 0 : index
    %c208 = arith.constant 208 : index
    %80 = vector.load %arg7[%c0_68, %c208] : memref<8x256xf32, #tpu.memory_space<vmem>>, vector<8x16xf32>
    %cst_69 = arith.constant dense<0.000000e+00> : vector<8x64xf32>
    %81 = tpu.matmul %80, %14, %cst_69 {dimension_numbers = #tpu.dot_dimension_numbers<[1], [0], [0], [1], [0, 0, 1, 1], [], []>} : vector<8x16xf32>, vector<16x64xf32>, vector<8x64xf32> -> vector<8x64xf32>
    %c0_70 = arith.constant 0 : index
    %c0_71 = arith.constant 0 : index
    %c832 = arith.constant 832 : index
    %82 = vector.load %arg6[%c0_70, %c0_71, %c832] : memref<1x8x1024xf32, #tpu.memory_space<vmem>>, vector<1x8x64xf32>
    %83 = vector.shape_cast %82 : vector<1x8x64xf32> to vector<8x64xf32>
    %84 = vector.shape_cast %81 : vector<8x64xf32> to vector<1x8x64xf32>
    tpu.vector_store %arg6[%c0_70, %c0_71, %c832], %84 {strides = array<i32>} : memref<1x8x1024xf32, #tpu.memory_space<vmem>>, vector<1x8x64xf32>,
    %c0_72 = arith.constant 0 : index
    %c224 = arith.constant 224 : index
    %85 = vector.load %arg7[%c0_72, %c224] : memref<8x256xf32, #tpu.memory_space<vmem>>, vector<8x16xf32>
    %cst_73 = arith.constant dense<0.000000e+00> : vector<8x64xf32>
    %86 = tpu.matmul %85, %14, %cst_73 {dimension_numbers = #tpu.dot_dimension_numbers<[1], [0], [0], [1], [0, 0, 1, 1], [], []>} : vector<8x16xf32>, vector<16x64xf32>, vector<8x64xf32> -> vector<8x64xf32>
    %c0_74 = arith.constant 0 : index
    %c0_75 = arith.constant 0 : index
    %c896 = arith.constant 896 : index
    %87 = vector.load %arg6[%c0_74, %c0_75, %c896] : memref<1x8x1024xf32, #tpu.memory_space<vmem>>, vector<1x8x64xf32>
    %88 = vector.shape_cast %87 : vector<1x8x64xf32> to vector<8x64xf32>
    %89 = vector.shape_cast %86 : vector<8x64xf32> to vector<1x8x64xf32>
    tpu.vector_store %arg6[%c0_74, %c0_75, %c896], %89 {strides = array<i32>} : memref<1x8x1024xf32, #tpu.memory_space<vmem>>, vector<1x8x64xf32>,
    %c0_76 = arith.constant 0 : index
    %c240 = arith.constant 240 : index
    %90 = vector.load %arg7[%c0_76, %c240] : memref<8x256xf32, #tpu.memory_space<vmem>>, vector<8x16xf32>
    %cst_77 = arith.constant dense<0.000000e+00> : vector<8x64xf32>
    %91 = tpu.matmul %90, %14, %cst_77 {dimension_numbers = #tpu.dot_dimension_numbers<[1], [0], [0], [1], [0, 0, 1, 1], [], []>} : vector<8x16xf32>, vector<16x64xf32>, vector<8x64xf32> -> vector<8x64xf32>
    %c0_78 = arith.constant 0 : index
    %c0_79 = arith.constant 0 : index
    %c960 = arith.constant 960 : index
    %92 = vector.load %arg6[%c0_78, %c0_79, %c960] : memref<1x8x1024xf32, #tpu.memory_space<vmem>>, vector<1x8x64xf32>
    %93 = vector.shape_cast %92 : vector<1x8x64xf32> to vector<8x64xf32>
    %94 = vector.shape_cast %91 : vector<8x64xf32> to vector<1x8x64xf32>
    tpu.vector_store %arg6[%c0_78, %c0_79, %c960], %94 {strides = array<i32>} : memref<1x8x1024xf32, #tpu.memory_space<vmem>>, vector<1x8x64xf32>,
    return
  }
  func.func @transform_0(%arg0: i32, %arg1: i32) -> (i32, i32, i32) {
    %c0_i32 = arith.constant 0 : i32
    %c0_i32_0 = arith.constant 0 : i32
    return %arg0, %c0_i32, %arg1 : i32, i32, i32
  }
  func.func @transform_1(%arg0: i32, %arg1: i32) -> (i32, i32) {
    %c0_i32 = arith.constant 0 : i32
    %c0_i32_0 = arith.constant 0 : i32
    %c0_i32_1 = arith.constant 0 : i32
    return %c0_i32, %c0_i32_0 : i32, i32
  }
  func.func @transform_2(%arg0: i32, %arg1: i32) -> (i32, i32) {
    %c0_i32 = arith.constant 0 : i32
    %c0_i32_0 = arith.constant 0 : i32
    %c0_i32_1 = arith.constant 0 : i32
    return %c0_i32, %c0_i32_0 : i32, i32
  }
  func.func @transform_3(%arg0: i32, %arg1: i32) -> (i32, i32) {
    %c0_i32 = arith.constant 0 : i32
    %c0_i32_0 = arith.constant 0 : i32
    %c0_i32_1 = arith.constant 0 : i32
    return %c0_i32, %c0_i32_0 : i32, i32
  }
  func.func @transform_4(%arg0: i32, %arg1: i32) -> (i32, i32, i32) {
    %c0_i32 = arith.constant 0 : i32
    %c0_i32_0 = arith.constant 0 : i32
    return %arg0, %c0_i32, %arg1 : i32, i32, i32
  }
}

</mosaic_0001>

<bundles_post_ra>
// kernel: upsample_block_forward.1
= control target key start
LH: loop header
LB: loop body
LE: loop exit
PB: predicated region body
PF: predicated region fallthrough
CT: control target
= control target key end

     0   :  { %s1992_s15 = smov 0   ;;  %s1994_s16 = smov 0   ;;  %s2212_s0 = inlined_call_operand.vmem [shape: f32[2,4,256], index: 0, kind: input, shape index: {}]   ;;  %s2213_s1 = inlined_call_operand.vmem [shape: f32[8,4], index: 1, kind: input, shape index: {}]   ;;  %s2214_s2 = inlined_call_operand.vmem [shape: f32[16,64], index: 2, kind: input, shape index: {}]   ;;  %s2215_s3 = inlined_call_operand.vmem [shape: f32[8,1], index: 3, kind: input, shape index: {}]   ;;  %s2216_s4 = inlined_call_operand.vmem [shape: f32[2,8,1024], index: 4, kind: output, shape index: {}]  }
   0x1   :  { %s1996_s17 = smov 0  }
   0x2 LB: > { %s26_s18 = sadd.s32 1, %s1951_s16  ;;  %p1699_p0 = scmp.ge.s32.totalorder %s1955_s17, 1  ;;  %s1955_s17 = sphi %s1996_s17, %s14_s17   ;;  %s1951_s16 = sphi %s1994_s16, %s2218_s16   ;;  %s1947_s15 = sphi %s1992_s15, %s2217_s15  }
   0x3   : > { %p28_p1 = scmp.ge.s32.totalorder %s26_s18, 2  ;;  %p183_p2 = scmp.lt.s32.totalorder %s1955_s17, 3 }
   0x5   : > { %s2220_s18 = smov (%p28_p1, %s26_s18), 0  ;;  %p184_p3 = pnand %p1699_p0, %p183_p2 }
   0x6   : > { %p218_p4 = scmp.lt.s32.totalorder (!%p184_p3), %s1947_s15, 1  ;;  %s1960_s5 = smov (!%p184_p3), 80  }
   0x7   : > { %187 = sbr.rel (%p184_p3) target bundleno = 707 (0x2c3), region = 36  ;;  %s1961_s6 = smov (!%p184_p3), 112  }
   0x8   : > { %s1962_s7 = smov (!%p184_p3), 48   ;;  %s1963_s8 = smov (!%p184_p3), 16  }
   0x9   : > { %s1964_s9 = smov (!%p184_p3), 96   ;;  %s1965_s10 = smov (!%p184_p3), 64  }
   0xa   : > { %s1966_s11 = smov (!%p184_p3), 32  }
   0xc   : > { %v1957_v0 = vmov 0.0   ;;  %v1958_v1 = vmov 0   ;;  %v239_v2 = vld [vmem:[%s2215_s3] sm:$0xff]  ;;  %s2222_s15 = smov (!%p218_p4, %s1947_s15), 1  ;;  %vm251_vm0 = vcmask 1043456   ;;  %vm247_vm1 = vcmask 31744  }
   0xd   : > { %320 = vmatprep.mubr.f32.mxu0 %v1957_v0  ;;  %1923 = vset.pattern.permute.xlu0 %v1958_v1  ;;  %s1727_s21 = sshll.u32 %s2222_s15, 3  ;;  %v237_v5 = vld [vmem:[%s2213_s1] sm:$0xff]  ;;  %v2028_v6 = vld [vmem:[%s2214_s2 + $0x8] sm:$0xff]  ;;  %vm1959_vm2 = vmmov 0   ;;  %vm346_vm3 = vcmask 130048   ;;  %s1728_s12 = sshll.u32 %s2222_s15, 6 }
   0xe   : > { %242 = vperm.xlu0 %1923, %v239_v2   ;;  %1777 = vmatprep.subr.mxu1 %v1957_v0  ;;  %s225_s24 = scalar_lea.vmem %s2212_s0, %s1727_s21  ;;  %v2036_v7 = vld [vmem:[%s2214_s2] sm:$0xff]  ;;  %s2161_s19 = scalar_lea.vmem %s2216_s4, %s1728_s12  ;;  %vm420_vm4 = vcmask 523264   ;;  %vm502_vm5 = vcmask 1048064  }
   0xf   : > { %v238_v3 = vld [vmem:[%s225_s24] sm:$0xff]  ;;  %1778 = vmatpush3.msra.mxu1 %v2028_v6  ;;  %1781 = vmatprep.mubr.msk.f32.mxu1 %vm1959_vm2, %v1957_v0 }
  0x10   : > { %v246_v4 = vcombine.high %v238_v3, %v238_v3  ;;  %1779 = vmatprep.subr.mxu1 %v1957_v0 }
  0x11   : > { %1780 = vmatpush3.msra.mxu1 %v2036_v7 }
  0x12   : > { %1704 = vmatprep.subr.msk.mxu0 %vm251_vm0, %v246_v4  ;;  %1791 = vmatprep.subr.mxu1 %v1957_v0 }
  0x13   : > { %1705 = vmatpush1.msk.msra.mxu0 %vm251_vm0, %v238_v3 }
  0x14   : > { %1706 = vmatmul.mubr.msk.f32.vlgmr.msra.gmra.mxu0 %vm247_vm1, %v237_v5  ;;  %1784 = vmatprep.subr.mxu0 %v1957_v0 }
  0x15   : > { %1785 = vmatpush3.msra.mxu0 %v2028_v6  ;;  %1788 = vmatprep.mubr.msk.f32.mxu0 %vm1959_vm2, %v1957_v0 }
  0x16   : > { %1786 = vmatprep.subr.mxu0 %v1957_v0 }
  0x17   : > { %1787 = vmatpush3.msra.mxu0 %v2036_v7 }
  0x18   : > { %1798 = vmatprep.subr.mxu0 %v1957_v0 }
  0x89   : > { %v243_v8 = vpop.permute.xlu0 %242 }
  0xd4   : > { %v322_v9 = vpop.f32.mrf.mxu0 }
  0xd5   : > { %v323_v10 = vadd.f32 %v322_v9, %v243_v8 }
  0xd6   : > { %v324_v11 = vpop.f32.mrf.mxu0 }
  0xd7   : > { %v1707_v12 = vmul.f32 -1.442695, %v323_v10  ;;  %v325_v13 = vadd.f32 %v324_v11, %v243_v8 }
  0xd9   : > { %1925 = vpow2.f32 %v1707_v12  ;;  %v1708_v14 = vmul.f32 -1.442695, %v325_v13 }
  0xdb   : > { %1927 = vpow2.f32 %v1708_v14 }
  0xe6   : > { %v1926_v15 = vpop.eup %1925 }
  0xe7   : > { %v333_v16 = vadd.f32 1.0, %v1926_v15 }
  0xe8   : > { %v1928_v17 = vpop.eup %1927 }
  0xe9   : > { %1929 = vrcp.f32 %v333_v16  ;;  %v334_v18 = vadd.f32 1.0, %v1928_v17 }
  0xeb   : > { %1931 = vrcp.f32 %v334_v18 }
  0xf6   : > { %v1930_v19 = vpop.eup %1929 }
  0xf7   : > { %v339_v20 = vmul.f32 %v1930_v19, %v323_v10 }
  0xf8   : > { %v1932_v21 = vpop.eup %1931 }
  0xf9   : > { %583 = vrot.lane.b32.xlu1 %v339_v20, %s1960_s5  ;;  %424 = vrot.lane.b32.xlu0 %v339_v20, %s1961_s6  ;;  %v2053_v22 = vmul.f32 %v1932_v21, %v325_v13 }
  0xfa   : > { %1782 = vmatmul.mubr.msk.f32.vlgmr.msra.gmra.mxu1 %vm346_vm3, %v339_v20 }
  0xfb   : > { %1792 = vmatpush3.msra.mxu1 %v2028_v6  ;;  %1795 = vmatprep.mubr.msk.f32.mxu1 %vm1959_vm2, %v1957_v0 }
  0xfc   : > { %1793 = vmatprep.subr.mxu1 %v1957_v0 }
  0xfd   : > { %741 = vrot.lane.b32.xlu1 %v339_v20, %s1962_s7  ;;  %899 = vrot.lane.b32.xlu0 %v339_v20, %s1963_s8 }
  0xfe   : > { %1794 = vmatpush3.msra.mxu1 %v2036_v7 }
  0xff   : > { %1805 = vmatprep.subr.mxu1 %v1957_v0 }
 0x101   : > { %1055 = vrot.lane.b32.xlu1 %v2053_v22, %s1961_s6  ;;  %1213 = vrot.lane.b32.xlu0 %v2053_v22, %s1960_s5 }
 0x105   : > { %1371 = vrot.lane.b32.xlu1 %v2053_v22, %s1962_s7  ;;  %1529 = vrot.lane.b32.xlu0 %v2053_v22, %s1963_s8 }
 0x109   : > { %506 = vrot.lane.b32.xlu1 %v339_v20, %s1964_s9  ;;  %664 = vrot.lane.b32.xlu0 %v339_v20, %s1965_s10 }
 0x10d   : > { %822 = vrot.lane.b32.xlu1 %v339_v20, %s1966_s11  ;;  %1136 = vrot.lane.b32.xlu0 %v2053_v22, %s1964_s9 }
 0x111   : > { %1294 = vrot.lane.b32.xlu1 %v2053_v22, %s1965_s10  ;;  %1452 = vrot.lane.b32.xlu0 %v2053_v22, %s1966_s11 }
 0x16b   : > { %v584_v23 = vpop.permute.xlu1 %583  ;;  %v425_v24 = vpop.permute.xlu0 %424 }
 0x16c   : > { %1789 = vmatmul.mubr.msk.f32.vlgmr.msra.gmra.mxu0 %vm346_vm3, %v425_v24 }
 0x16d   : > { %1799 = vmatpush3.msra.mxu0 %v2028_v6  ;;  %1802 = vmatprep.mubr.msk.f32.mxu0 %vm1959_vm2, %v1957_v0 }
 0x16e   : > { %1800 = vmatprep.subr.mxu0 %v1957_v0 }
 0x16f   : > { %1801 = vmatpush3.msra.mxu0 %v2036_v7  ;;  %v742_v25 = vpop.permute.xlu1 %741  ;;  %v900_v26 = vpop.permute.xlu0 %899 }
 0x170   : > { %1812 = vmatprep.subr.mxu0 %v1957_v0  ;;  %1803 = vmatmul.mubr.msk.f32.vlgmr.msra.gmra.mxu0 %vm346_vm3, %v584_v23 }
 0x171   : > { %1813 = vmatpush3.msra.mxu0 %v2028_v6  ;;  %1816 = vmatprep.mubr.msk.f32.mxu0 %vm1959_vm2, %v1957_v0 }
 0x172   : > { %1814 = vmatprep.subr.mxu0 %v1957_v0 }
 0x173   : > { %1815 = vmatpush3.msra.mxu0 %v2036_v7  ;;  %v1056_v27 = vpop.permute.xlu1 %1055  ;;  %v1214_v28 = vpop.permute.xlu0 %1213 }
 0x174   : > { %1826 = vmatprep.subr.mxu0 %v1957_v0  ;;  %1817 = vmatmul.mubr.msk.f32.vlgmr.msra.gmra.mxu0 %vm346_vm3, %v742_v25 }
 0x175   : > { %1827 = vmatpush3.msra.mxu0 %v2028_v6  ;;  %1830 = vmatprep.mubr.msk.f32.mxu0 %vm1959_vm2, %v1957_v0 }
 0x176   : > { %1828 = vmatprep.subr.mxu0 %v1957_v0 }
 0x177   : > { %1829 = vmatpush3.msra.mxu0 %v2036_v7  ;;  %v1372_v29 = vpop.permute.xlu1 %1371  ;;  %v1530_v30 = vpop.permute.xlu0 %1529 }
 0x178   : > { %1840 = vmatprep.subr.mxu0 %v1957_v0  ;;  %1831 = vmatmul.mubr.msk.f32.vlgmr.msra.gmra.mxu0 %vm346_vm3, %v900_v26 }
 0x179   : > { %1841 = vmatpush3.msra.mxu0 %v2028_v6  ;;  %1844 = vmatprep.mubr.msk.f32.mxu0 %vm1959_vm2, %v1957_v0 }
 0x17a   : > { %1842 = vmatprep.subr.mxu0 %v1957_v0 }
 0x17b   : > { %1843 = vmatpush3.msra.mxu0 %v2036_v7  ;;  %v507_v31 = vpop.permute.xlu1 %506  ;;  %v665_v32 = vpop.permute.xlu0 %664 }
 0x17c   : > { %1854 = vmatprep.subr.mxu0 %v1957_v0  ;;  %1796 = vmatmul.mubr.msk.f32.vlgmr.msra.gmra.mxu1 %vm346_vm3, %v507_v31 }
 0x17d   : > { %1845 = vmatmul.mubr.msk.f32.vlgmr.msra.gmra.mxu0 %vm346_vm3, %v1056_v27  ;;  %1806 = vmatpush3.msra.mxu1 %v2028_v6 }
 0x17e   : > { %1855 = vmatpush3.msra.mxu0 %v2028_v6  ;;  %1807 = vmatprep.subr.mxu1 %v1957_v0 }
 0x17f   : > { %1856 = vmatprep.subr.mxu0 %v1957_v0  ;;  %1858 = vmatprep.mubr.msk.f32.mxu0 %vm1959_vm2, %v1957_v0  ;;  %v823_v33 = vpop.permute.xlu1 %822  ;;  %v1137_v34 = vpop.permute.xlu0 %1136 }
 0x180   : > { %1857 = vmatpush3.msra.mxu0 %v2036_v7  ;;  %1808 = vmatpush3.msra.mxu1 %v2036_v7 }
 0x181   : > { %1868 = vmatprep.subr.mxu0 %v1957_v0  ;;  %1809 = vmatprep.mubr.msk.f32.mxu1 %vm1959_vm2, %v1957_v0 }
 0x182   : > { %1810 = vmatmul.mubr.msk.f32.vlgmr.msra.gmra.mxu1 %vm346_vm3, %v665_v32  ;;  %1819 = vmatprep.subr.mxu1 %v1957_v0 }
 0x183   : > { %1859 = vmatmul.mubr.msk.f32.vlgmr.msra.gmra.mxu0 %vm346_vm3, %v1214_v28  ;;  %1820 = vmatpush3.msra.mxu1 %v2028_v6  ;;  %v1295_v35 = vpop.permute.xlu1 %1294  ;;  %v1453_v36 = vpop.permute.xlu0 %1452 }
 0x184   : > { %1869 = vmatpush3.msra.mxu0 %v2028_v6  ;;  %1821 = vmatprep.subr.mxu1 %v1957_v0 }
 0x185   : > { %1870 = vmatprep.subr.mxu0 %v1957_v0  ;;  %1872 = vmatprep.mubr.msk.f32.mxu0 %vm1959_vm2, %v1957_v0 }
 0x186   : > { %1871 = vmatpush3.msra.mxu0 %v2036_v7  ;;  %1822 = vmatpush3.msra.mxu1 %v2036_v7 }
 0x187   : > { %1882 = vmatprep.subr.mxu0 %v1957_v0  ;;  %1823 = vmatprep.mubr.msk.f32.mxu1 %vm1959_vm2, %v1957_v0 }
 0x188   : > { %1824 = vmatmul.mubr.msk.f32.vlgmr.msra.gmra.mxu1 %vm346_vm3, %v823_v33  ;;  %1833 = vmatprep.subr.mxu1 %v1957_v0 }
 0x189   : > { %1873 = vmatmul.mubr.msk.f32.vlgmr.msra.gmra.mxu0 %vm346_vm3, %v1372_v29  ;;  %1834 = vmatpush3.msra.mxu1 %v2028_v6 }
 0x18a   : > { %1883 = vmatpush3.msra.mxu0 %v2028_v6  ;;  %1835 = vmatprep.subr.mxu1 %v1957_v0 }
 0x18b   : > { %1884 = vmatprep.subr.mxu0 %v1957_v0  ;;  %1836 = vmatpush3.msra.mxu1 %v2036_v7 }
 0x18c   : > { %1885 = vmatpush3.msra.mxu0 %v2036_v7  ;;  %1837 = vmatprep.mubr.msk.f32.mxu1 %vm1959_vm2, %v1957_v0 }
 0x18d   : > { %1886 = vmatprep.mubr.msk.f32.mxu0 %vm1959_vm2, %v1957_v0  ;;  %1838 = vmatmul.mubr.msk.f32.vlgmr.msra.gmra.mxu1 %vm346_vm3, %v2053_v22 }
 0x18e   : > { %1847 = vmatprep.subr.mxu1 %v1957_v0  ;;  %1887 = vmatmul.mubr.msk.f32.vlgmr.msra.gmra.mxu0 %vm346_vm3, %v1530_v30 }
 0x18f   : > { %1848 = vmatpush3.msra.mxu1 %v2028_v6  ;;  %1851 = vmatprep.mubr.msk.f32.mxu1 %vm1959_vm2, %v1957_v0 }
 0x190   : > { %1849 = vmatprep.subr.mxu1 %v1957_v0 }
 0x191   : > { %1850 = vmatpush3.msra.mxu1 %v2036_v7 }
 0x192   : > { %1852 = vmatmul.mubr.msk.f32.vlgmr.msra.gmra.mxu1 %vm346_vm3, %v1137_v34  ;;  %1861 = vmatprep.subr.mxu1 %v1957_v0 }
 0x193   : > { %1862 = vmatpush3.msra.mxu1 %v2028_v6  ;;  %1865 = vmatprep.mubr.msk.f32.mxu1 %vm1959_vm2, %v1957_v0 }
 0x194   : > { %1863 = vmatprep.subr.mxu1 %v1957_v0 }
 0x195   : > { %1864 = vmatpush3.msra.mxu1 %v2036_v7 }
 0x196   : > { %1866 = vmatmul.mubr.msk.f32.vlgmr.msra.gmra.mxu1 %vm346_vm3, %v1295_v35  ;;  %1875 = vmatprep.subr.mxu1 %v1957_v0 }
 0x197   : > { %1876 = vmatpush3.msra.mxu1 %v2028_v6  ;;  %1879 = vmatprep.mubr.msk.f32.mxu1 %vm1959_vm2, %v1957_v0 }
 0x198   : > { %1877 = vmatprep.subr.mxu1 %v1957_v0 }
 0x199   : > { %1878 = vmatpush3.msra.mxu1 %v2036_v7 }
 0x19a   : > { %1880 = vmatmul.mubr.msk.f32.vlgmr.msra.gmra.mxu1 %vm346_vm3, %v1453_v36 }
 0x1ba   : > { %v416_v37 = vpop.f32.mrf.mxu1 }
 0x1bb   : > { %421 = vst.msk [vmem:[%s2161_s19] sm:$0xff] %vm420_vm4, %v416_v37 }
 0x1bc   : > { %v1783_v38 = vpop.f32.mrf.mxu1 }
 0x22c   : > { %v494_v39 = vpop.f32.mrf.mxu0 }
 0x22d   : > { %499 = vrot.lane.b32.xlu1 %v494_v39, %s1965_s10 }
 0x22e   : > { %v1790_v40 = vpop.f32.mrf.mxu0 }
 0x230   : > { %v653_v41 = vpop.f32.mrf.mxu0 }
 0x231   : > { %658 = vrot.lane.b32.xlu0 %v653_v41, %s1965_s10 }
 0x232   : > { %v1804_v42 = vpop.f32.mrf.mxu0 }
 0x234   : > { %v811_v43 = vpop.f32.mrf.mxu0 }
 0x235   : > { %816 = vrot.lane.b32.xlu1 %v811_v43, %s1965_s10 }
 0x236   : > { %v1818_v44 = vpop.f32.mrf.mxu0 }
 0x238   : > { %v969_v45 = vpop.f32.mrf.mxu0 }
 0x239   : > { %974 = vrot.lane.b32.xlu0 %v969_v45, %s1965_s10 }
 0x23a   : > { %v1832_v46 = vpop.f32.mrf.mxu0 }
 0x23c   : > { %v576_v47 = vpop.f32.mrf.mxu1 }
 0x23d   : > { %580 = vst.msk [vmem:[%s2161_s19 + $0x8] sm:$0xff] %vm420_vm4, %v576_v47  ;;  %v1125_v48 = vpop.f32.mrf.mxu0 }
 0x23e   : > { %1130 = vrot.lane.b32.xlu1 %v1125_v48, %s1965_s10  ;;  %v1797_v49 = vpop.f32.mrf.mxu1 }
 0x23f   : > { %v1846_v50 = vpop.f32.mrf.mxu0 }
 0x242   : > { %v734_v51 = vpop.f32.mrf.mxu1 }
 0x243   : > { %738 = vst.msk [vmem:[%s2161_s19 + $0x10] sm:$0xff] %vm420_vm4, %v734_v51  ;;  %v1283_v52 = vpop.f32.mrf.mxu0 }
 0x244   : > { %1288 = vrot.lane.b32.xlu0 %v1283_v52, %s1965_s10  ;;  %v1811_v53 = vpop.f32.mrf.mxu1 }
 0x245   : > { %v1860_v54 = vpop.f32.mrf.mxu0 }
 0x248   : > { %v892_v55 = vpop.f32.mrf.mxu1 }
 0x249   : > { %896 = vst.msk [vmem:[%s2161_s19 + $0x18] sm:$0xff] %vm420_vm4, %v892_v55  ;;  %v1441_v56 = vpop.f32.mrf.mxu0 }
 0x24a   : > { %1446 = vrot.lane.b32.xlu1 %v1441_v56, %s1965_s10  ;;  %v1825_v57 = vpop.f32.mrf.mxu1 }
 0x24b   : > { %v1874_v58 = vpop.f32.mrf.mxu0 }
 0x24d   : > { %v1048_v59 = vpop.f32.mrf.mxu1 }
 0x24e   : > { %1052 = vst.msk [vmem:[%s2161_s19 + $0x20] sm:$0xff] %vm420_vm4, %v1048_v59  ;;  %v1599_v60 = vpop.f32.mrf.mxu0 }
 0x24f   : > { %1604 = vrot.lane.b32.xlu0 %v1599_v60, %s1965_s10  ;;  %v1839_v61 = vpop.f32.mrf.mxu1 }
 0x250   : > { %v1888_v62 = vpop.f32.mrf.mxu0 }
 0x252   : > { %v1206_v63 = vpop.f32.mrf.mxu1 }
 0x253   : > { %1210 = vst.msk [vmem:[%s2161_s19 + $0x28] sm:$0xff] %vm420_vm4, %v1206_v63 }
 0x254   : > { %v1853_v0 = vpop.f32.mrf.mxu1 }
 0x256   : > { %v1364_v1 = vpop.f32.mrf.mxu1 }
 0x257   : > { %1368 = vst.msk [vmem:[%s2161_s19 + $0x30] sm:$0xff] %vm420_vm4, %v1364_v1 }
 0x258   : > { %v1867_v2 = vpop.f32.mrf.mxu1 }
 0x25a   : > { %v1522_v3 = vpop.f32.mrf.mxu1 }
 0x25b   : > { %1526 = vst.msk [vmem:[%s2161_s19 + $0x38] sm:$0xff] %vm420_vm4, %v1522_v3 }
 0x25c   : > { %v1881_v4 = vpop.f32.mrf.mxu1 }
 0x29f   : > { %v500_v5 = vpop.permute.xlu1 %499 }
 0x2a0   : > { %503 = vst.msk [vmem:[%s2161_s19] sm:$0xff] %vm502_vm5, %v500_v5 }
 0x2a3   : > { %v659_v6 = vpop.permute.xlu0 %658 }
 0x2a4   : > { %661 = vst.msk [vmem:[%s2161_s19 + $0x8] sm:$0xff] %vm502_vm5, %v659_v6 }
 0x2a7   : > { %v817_v7 = vpop.permute.xlu1 %816 }
 0x2a8   : > { %819 = vst.msk [vmem:[%s2161_s19 + $0x10] sm:$0xff] %vm502_vm5, %v817_v7 }
 0x2ab   : > { %v975_v8 = vpop.permute.xlu0 %974 }
 0x2ac   : > { %977 = vst.msk [vmem:[%s2161_s19 + $0x18] sm:$0xff] %vm502_vm5, %v975_v8 }
 0x2b0   : > { %v1131_v9 = vpop.permute.xlu1 %1130 }
 0x2b1   : > { %1133 = vst.msk [vmem:[%s2161_s19 + $0x20] sm:$0xff] %vm502_vm5, %v1131_v9 }
 0x2b6   : > { %v1289_v10 = vpop.permute.xlu0 %1288 }
 0x2b7   : > { %1291 = vst.msk [vmem:[%s2161_s19 + $0x28] sm:$0xff] %vm502_vm5, %v1289_v10 }
 0x2bc   : > { %v1447_v11 = vpop.permute.xlu1 %1446 }
 0x2bd   : > { %1449 = vst.msk [vmem:[%s2161_s19 + $0x30] sm:$0xff] %vm502_vm5, %v1447_v11 }
 0x2c1   : > { %v1605_v12 = vpop.permute.xlu0 %1604 }
 0x2c2   : > { %1607 = vst.msk [vmem:[%s2161_s19 + $0x38] sm:$0xff] %vm502_vm5, %v1605_v12 }
 0x2c3 PF: > { %s14_s17 = sadd.s32 1, %s1955_s17   ;;  %s2217_s15 = smov %s1951_s16 }
 0x2c4   : > { %p11_p5 = scmp.ge.s32.totalorder %s14_s17, 4   ;;  %s2218_s16 = smov %s2220_s18 }
 0x2c6   :  { %13 = sbr.rel (!%p11_p5) target bundleno = 2 (0x2), region = 66 }

</bundles_post_ra>
